<compile_context>
chip_gen: v5e
topology: v5e:2x2
jax: 0.10.0
libtpu: 0.0.40
codegen_flags: <defaults>
</compile_context>

<pallas_src>
import functools

import jax
import jax.numpy as jnp
from jax import lax
from jax.experimental import pallas as pl
from jax.experimental.pallas import tpu as pltpu

EPS = 1e-5  # nn.BatchNorm1d default


def _round_up(x, m):
    return ((x + m - 1) // m) * m


def _bn_scale_shift(sum_v, sq_v, b, g, bt, nv_f, npad_f):
    """Fused BN affine from accumulated sum / sum-of-squares.

    Padded lanes (beyond n_valid) hold exactly `bias` (xcol pad columns are zero),
    so they are removed analytically instead of masking every tile.
    Note: E[y^2]-E[y]^2 in f32 is fine at these reduction sizes; a Welford/two-pass
    form would be preferable for very large N*L if strict parity matters.
    """
    s = sum_v - npad_f * b
    q = sq_v - npad_f * (b * b)
    inv_n = 1.0 / nv_f
    mean = s * inv_n
    var = q * inv_n - mean * mean          # biased variance (training-mode BN)
    inv_std = lax.rsqrt(var + EPS)
    scale = g * inv_std
    shift = bt - mean * scale
    return scale, shift


# ---------------------------------------------------------------------------
# Path A: single pass, conv result resident in the VMEM output block.
# ---------------------------------------------------------------------------
def convblock_resident_kernel(nv_ref, xcol_ref, w_ref, b_ref, g_ref, bt_ref,
                              o_ref, sum_ref, sq_ref):
    # xcol_ref: (KC_p, tl)  w_ref: (C_out_p, KC_p)  b/g/bt: (C_out_p, 1) f32
    # o_ref: (C_out_p, P) resident across the whole grid (constant block index)
    j = pl.program_id(0)
    n_tiles = pl.num_programs(0)
    tl = xcol_ref.shape[1]

    # Conv1d as ONE MXU matmul contracting over K*C_in (im2col), f32 accumulation.
    y = jnp.dot(w_ref[...], xcol_ref[...], preferred_element_type=jnp.float32)
    y = y + b_ref[...]                                      # (C_out_p, tl) f32

    @pl.when(j == 0)
    def _init():
        sum_ref[...] = jnp.zeros_like(sum_ref)
        sq_ref[...] = jnp.zeros_like(sq_ref)

    sum_ref[...] += jnp.sum(y, axis=1, keepdims=True)       # lane reduce -> XLU
    sq_ref[...] += jnp.sum(y * y, axis=1, keepdims=True)

    # Stash conv result in the resident output block (no HBM write until grid end).
    off = pl.multiple_of(j * tl, 128)
    o_ref[:, pl.ds(off, tl)] = y

    @pl.when(j == n_tiles - 1)
    def _finalize():
        nv_f = nv_ref[0].astype(jnp.float32)
        npad_f = jnp.float32(o_ref.shape[1]) - nv_f
        scale, shift = _bn_scale_shift(sum_ref[...], sq_ref[...], b_ref[...],
                                       g_ref[...], bt_ref[...], nv_f, npad_f)
        o_ref[...] = jnp.maximum(o_ref[...] * scale + shift, 0.0)


# ---------------------------------------------------------------------------
# Path B (fallback for very large C_out*P): two pallas_calls.
# ---------------------------------------------------------------------------
def conv_stats_kernel(nv_ref, xcol_ref, w_ref, b_ref, g_ref, bt_ref,
                      y_ref, scale_ref, shift_ref, sum_ref, sq_ref,
                      *, total_lanes):
    j = pl.program_id(0)
    n_tiles = pl.num_programs(0)

    y = jnp.dot(w_ref[...], xcol_ref[...], preferred_element_type=jnp.float32)
    y = y + b_ref[...]

    @pl.when(j == 0)
    def _init():
        sum_ref[...] = jnp.zeros_like(sum_ref)
        sq_ref[...] = jnp.zeros_like(sq_ref)

    sum_ref[...] += jnp.sum(y, axis=1, keepdims=True)
    sq_ref[...] += jnp.sum(y * y, axis=1, keepdims=True)
    y_ref[...] = y                                           # raw conv tile, written once

    @pl.when(j == n_tiles - 1)
    def _finalize():
        nv_f = nv_ref[0].astype(jnp.float32)
        npad_f = jnp.float32(total_lanes) - nv_f
        scale, shift = _bn_scale_shift(sum_ref[...], sq_ref[...], b_ref[...],
                                       g_ref[...], bt_ref[...], nv_f, npad_f)
        scale_ref[...] = scale
        shift_ref[...] = shift


def bn_relu_kernel(y_ref, scale_ref, shift_ref, o_ref):
    # Pure-VPU fused BN affine + ReLU over the stored conv result.
    o_ref[...] = jnp.maximum(y_ref[...] * scale_ref[...] + shift_ref[...], 0.0)


def _build_in_specs(KC_p, C_out_p, tl, n_tiles):
    # Deeper prefetch on the streamed xcol input when there are enough tiles.
    if n_tiles >= 3:
        xcol_spec = pl.BlockSpec((KC_p, tl), lambda j, nv: (0, j),
                                 pipeline_mode=pl.Buffered(3))
    else:
        xcol_spec = pl.BlockSpec((KC_p, tl), lambda j, nv: (0, j))
    const = lambda j, nv: (0, 0)
    return [xcol_spec,
            pl.BlockSpec((C_out_p, KC_p), const),
            pl.BlockSpec((C_out_p, 1), const),
            pl.BlockSpec((C_out_p, 1), const),
            pl.BlockSpec((C_out_p, 1), const)]


def conv_block(x, w, bias, gamma, beta, *, lane_tile=2048,
               compute_dtype=jnp.bfloat16, two_pass=None,
               vmem_budget=40 * 1024 * 1024):
    """x: (N, C_in, L); w: (C_out, C_in, K) (PyTorch Conv1d layout);
    bias/gamma/beta: (C_out,). Returns (N, C_out, L_out) f32 (training-mode BN)."""
    N, C_in, L = x.shape
    C_out, _, K = w.shape
    pad = 0 if K == 1 else 1                       # PyTorch ConvBlock padding rule
    L_out = L + 2 * pad - (K - 1)                  # correct for any kernel_size
    n_valid = N * L_out

    # ---- wrapper-side layout plumbing: halo pad + im2col + lane-dense batch fold ----
    # TODO(synk): im2col is still materialized in the wrapper (one extra HBM round trip
    # of ~K*C_in*P*2 bytes); an in-kernel halo-DMA im2col needs per-sample boundary
    # masking across the folded batch axis and is left for a follow-up.
    x_pad = jnp.pad(x.astype(jnp.float32), ((0, 0), (0, 0), (pad, pad)))
    cols = jnp.stack([x_pad[:, :, k:k + L_out] for k in range(K)], axis=0)  # (K,N,Cin,Lo)
    xcol = cols.transpose(0, 2, 1, 3).reshape(K * C_in, n_valid)            # (K*Cin, N*Lo)

    KC = K * C_in
    KC_p = _round_up(KC, 8)
    C_out_p = _round_up(C_out, 8)

    tl = _round_up(min(lane_tile, _round_up(n_valid, 128)), 128)   # lane tile
    P = _round_up(n_valid, tl)
    n_tiles = P // tl

    xcol = jnp.pad(xcol, ((0, KC_p - KC), (0, P - n_valid))).astype(compute_dtype)
    w_flat = w.astype(jnp.float32).transpose(0, 2, 1).reshape(C_out, KC)
    w_flat = jnp.pad(w_flat, ((0, C_out_p - C_out), (0, KC_p - KC))).astype(compute_dtype)
    b2 = jnp.pad(bias.astype(jnp.float32), (0, C_out_p - C_out)).reshape(C_out_p, 1)
    g2 = jnp.pad(gamma.astype(jnp.float32), (0, C_out_p - C_out)).reshape(C_out_p, 1)
    bt2 = jnp.pad(beta.astype(jnp.float32), (0, C_out_p - C_out)).reshape(C_out_p, 1)
    nv_arr = jnp.array([n_valid], dtype=jnp.int32)

    # ---- VMEM budgeting (v7x has only 64 MiB physical: keep need <= ~48 MiB) ----
    isz = jnp.dtype(compute_dtype).itemsize
    xcol_bufs = (3 if n_tiles >= 3 else 2) * KC_p * tl * isz
    w_bufs = 2 * C_out_p * KC_p * isz
    small = 16 * C_out_p * 4
    resident_need = C_out_p * P * 4 + xcol_bufs + w_bufs + small
    stream_need = 4 * C_out_p * tl * 4 + xcol_bufs + w_bufs + small
    use_resident = (resident_need + (2 << 20) <= vmem_budget) if two_pass is None \
        else (not two_pass)
    need = resident_need if use_resident else stream_need
    vmem_limit = int(min(48 << 20, max(16 << 20, need + (4 << 20))))

    in_specs = _build_in_specs(KC_p, C_out_p, tl, n_tiles)
    seq_params = pltpu.CompilerParams(dimension_semantics=("arbitrary",),
                                      vmem_limit_bytes=vmem_limit)

    if use_resident:
        out = pl.pallas_call(
            convblock_resident_kernel,
            out_shape=jax.ShapeDtypeStruct((C_out_p, P), jnp.float32),
            grid_spec=pltpu.PrefetchScalarGridSpec(
                num_scalar_prefetch=1,
                grid=(n_tiles,),
                in_specs=in_specs,
                out_specs=pl.BlockSpec((C_out_p, P), lambda j, nv: (0, 0)),
                scratch_shapes=[pltpu.VMEM((C_out_p, 1), jnp.float32),   # sum
                                pltpu.VMEM((C_out_p, 1), jnp.float32)],  # sum of squares
            ),
            compiler_params=seq_params,
        )(nv_arr, xcol, w_flat, b2, g2, bt2)
    else:
        kern1 = functools.partial(conv_stats_kernel, total_lanes=P)
        y, scale, shift = pl.pallas_call(
            kern1,
            out_shape=(jax.ShapeDtypeStruct((C_out_p, P), jnp.float32),
                       jax.ShapeDtypeStruct((C_out_p, 1), jnp.float32),
                       jax.ShapeDtypeStruct((C_out_p, 1), jnp.float32)),
            grid_spec=pltpu.PrefetchScalarGridSpec(
                num_scalar_prefetch=1,
                grid=(n_tiles,),
                in_specs=in_specs,
                out_specs=(pl.BlockSpec((C_out_p, tl), lambda j, nv: (0, j)),
                           pl.BlockSpec((C_out_p, 1), lambda j, nv: (0, 0)),
                           pl.BlockSpec((C_out_p, 1), lambda j, nv: (0, 0))),
                scratch_shapes=[pltpu.VMEM((C_out_p, 1), jnp.float32),
                                pltpu.VMEM((C_out_p, 1), jnp.float32)],
            ),
            compiler_params=seq_params,
        )(nv_arr, xcol, w_flat, b2, g2, bt2)

        out = pl.pallas_call(
            bn_relu_kernel,
            out_shape=jax.ShapeDtypeStruct((C_out_p, P), jnp.float32),
            grid_spec=pltpu.PrefetchScalarGridSpec(
                num_scalar_prefetch=0,
                grid=(n_tiles,),
                in_specs=[pl.BlockSpec((C_out_p, tl), lambda j: (0, j)),
                          pl.BlockSpec((C_out_p, 1), lambda j: (0, 0)),
                          pl.BlockSpec((C_out_p, 1), lambda j: (0, 0))],
                out_specs=pl.BlockSpec((C_out_p, tl), lambda j: (0, j)),
            ),
            compiler_params=pltpu.CompilerParams(
                dimension_semantics=("parallel",), vmem_limit_bytes=vmem_limit),
        )(y, scale, shift)

    # unfold lanes back to (N, C_out, L_out)
    return out[:C_out, :n_valid].reshape(C_out, N, L_out).transpose(1, 0, 2)


def ref_forward(x, w, bias, gamma, beta):
    """Pure-JAX reference matching PyTorch ConvBlock.forward (training mode)."""
    K = w.shape[2]
    pad = 0 if K == 1 else 1
    y = lax.conv_general_dilated(
        x, w, window_strides=(1,), padding=((pad, pad),),
        dimension_numbers=("NCH", "OIH", "NCH"),
    )
    y = y + bias.reshape(1, -1, 1)
    mean = jnp.mean(y, axis=(0, 2), keepdims=True)
    var = jnp.mean((y - mean) ** 2, axis=(0, 2), keepdims=True)
    yh = (y - mean) * lax.rsqrt(var + EPS)
    out = yh * gamma.reshape(1, -1, 1) + beta.reshape(1, -1, 1)
    return jnp.maximum(out, 0.0)


if __name__ == "__main__":
    # Small shapes consistent with the module: batch=2, in_channels=4,
    # out_channels=8, length=16, kernel_size=3.
    N, C_in, C_out, L, K = 2, 4, 8, 16, 3

    key = jax.random.PRNGKey(0)
    kx, kw, kb, kg, kbt, kx2 = jax.random.split(key, 6)

    x = jax.random.normal(kx, (N, C_in, L), dtype=jnp.float32)
    w = jax.random.normal(kw, (C_out, C_in, K), dtype=jnp.float32) * 0.3  # torch layout
    bias = jax.random.normal(kb, (C_out,), dtype=jnp.float32) * 0.1
    gamma = 1.0 + 0.1 * jax.random.normal(kg, (C_out,), dtype=jnp.float32)
    beta = 0.05 * jax.random.normal(kbt, (C_out,), dtype=jnp.float32)

    ref = ref_forward(x, w, bias, gamma, beta)

    # 1) single-pass VMEM-resident path, f32 MXU operands: strict parity.
    out = jax.block_until_ready(conv_block(x, w, bias, gamma, beta,
                                           compute_dtype=jnp.float32))
    assert out.shape == (N, C_out, L), out.shape
    assert jnp.allclose(out, ref, atol=1e-4, rtol=1e-4), float(jnp.max(jnp.abs(out - ref)))

    # 2) default bf16 MXU operands (halves xcol HBM traffic): loose parity
    #    (bf16 input quantization only; accumulation and BN are f32).
    out_bf = jax.block_until_ready(conv_block(x, w, bias, gamma, beta))
    assert jnp.allclose(out_bf, ref, atol=1e-1, rtol=1e-1), float(jnp.max(jnp.abs(out_bf - ref)))

    # 3) two-pass fallback (used when C_out*P*4 exceeds the VMEM budget): strict parity.
    out_2p = jax.block_until_ready(conv_block(x, w, bias, gamma, beta,
                                              compute_dtype=jnp.float32, two_pass=True))
    assert jnp.allclose(out_2p, ref, atol=1e-4, rtol=1e-4), float(jnp.max(jnp.abs(out_2p - ref)))

    # 4) slightly larger case exercising a multi-tile grid, Buffered(3) prefetch,
    #    dynamic-offset resident stores and the padded-lane stat correction.
    N2, L2 = 4, 80
    x2 = jax.random.normal(kx2, (N2, C_in, L2), dtype=jnp.float32)
    ref2 = ref_forward(x2, w, bias, gamma, beta)
    out2 = jax.block_until_ready(conv_block(x2, w, bias, gamma, beta,
                                            lane_tile=128, compute_dtype=jnp.float32))
    assert jnp.allclose(out2, ref2, atol=1e-4, rtol=1e-4), float(jnp.max(jnp.abs(out2 - ref2)))
    out2b = jax.block_until_ready(conv_block(x2, w, bias, gamma, beta,
                                             lane_tile=128, compute_dtype=jnp.float32,
                                             two_pass=True))
    assert jnp.allclose(out2b, ref2, atol=1e-4, rtol=1e-4), float(jnp.max(jnp.abs(out2b - ref2)))

    print("KERNEL_OK")
</pallas_src>

<mosaic_0001>
module attributes {stable_mosaic.version = 11 : i64} {
  func.func @convblock_resident_kernel(%arg0: i32, %arg1: memref<1xi32, #tpu.memory_space<smem>>, %arg2: memref<16x128xf32, #tpu.memory_space<vmem>>, %arg3: memref<8x16xf32, #tpu.memory_space<vmem>>, %arg4: memref<8x1xf32, #tpu.memory_space<vmem>>, %arg5: memref<8x1xf32, #tpu.memory_space<vmem>>, %arg6: memref<8x1xf32, #tpu.memory_space<vmem>>, %arg7: memref<8x128xf32, #tpu.memory_space<vmem>>, %arg8: memref<8x1xf32, #tpu.memory_space<vmem>>, %arg9: memref<8x1xf32, #tpu.memory_space<vmem>>) attributes {dimension_semantics = [#tpu.dimension_semantics<arbitrary>], iteration_bounds = array<i64: 1>, scalar_prefetch = 1 : i64, scratch_operands = 2 : i64, tpu.core_type = #tpu.core_type<tc>, window_params = [{transform_indices = @transform_0, window_bounds = array<i64: 16, 128>}, {pipeline_mode = #tpu.pipeline_mode<synchronous>, transform_indices = @transform_1, window_bounds = array<i64: 8, 16>}, {pipeline_mode = #tpu.pipeline_mode<synchronous>, transform_indices = @transform_2, window_bounds = array<i64: 8, 1>}, {pipeline_mode = #tpu.pipeline_mode<synchronous>, transform_indices = @transform_3, window_bounds = array<i64: 8, 1>}, {pipeline_mode = #tpu.pipeline_mode<synchronous>, transform_indices = @transform_4, window_bounds = array<i64: 8, 1>}, {pipeline_mode = #tpu.pipeline_mode<synchronous>, transform_indices = @transform_5, window_bounds = array<i64: 8, 128>}]} {
    %c0 = arith.constant 0 : index
    %c0_0 = arith.constant 0 : index
    %0 = vector.load %arg3[%c0, %c0_0] : memref<8x16xf32, #tpu.memory_space<vmem>>, vector<8x16xf32>
    %c0_1 = arith.constant 0 : index
    %c0_2 = arith.constant 0 : index
    %1 = vector.load %arg2[%c0_1, %c0_2] : memref<16x128xf32, #tpu.memory_space<vmem>>, vector<16x128xf32>
    %cst = arith.constant dense<0.000000e+00> : vector<8x128xf32>
    %2 = tpu.matmul %0, %1, %cst {dimension_numbers = #tpu.dot_dimension_numbers<[1], [0], [0], [1], [0, 0, 1, 1], [], []>} : vector<8x16xf32>, vector<16x128xf32>, vector<8x128xf32> -> vector<8x128xf32>
    %c0_3 = arith.constant 0 : index
    %c0_4 = arith.constant 0 : index
    %3 = vector.load %arg4[%c0_3, %c0_4] : memref<8x1xf32, #tpu.memory_space<vmem>>, vector<8x1xf32>
    %4 = vector.broadcast %3 : vector<8x1xf32> to vector<8x128xf32>
    %5 = arith.addf %2, %4 : vector<8x128xf32>
    %c0_i32 = arith.constant 0 : i32
    %6 = arith.cmpi eq, %arg0, %c0_i32 : i32
    %7 = arith.extui %6 : i1 to i32
    %c0_i32_5 = arith.constant 0 : i32
    %8 = arith.cmpi ne, %7, %c0_i32_5 : i32
    scf.if %8 {
      %cst_19 = arith.constant 0.000000e+00 : f32
      %27 = vector.broadcast %cst_19 : f32 to vector<8x1xf32>
      %c0_20 = arith.constant 0 : index
      %c0_21 = arith.constant 0 : index
      %28 = vector.load %arg8[%c0_20, %c0_21] : memref<8x1xf32, #tpu.memory_space<vmem>>, vector<8x1xf32>
      tpu.vector_store %arg8[%c0_20, %c0_21], %27 {strides = array<i32>} : memref<8x1xf32, #tpu.memory_space<vmem>>, vector<8x1xf32>,
      %cst_22 = arith.constant 0.000000e+00 : f32
      %29 = vector.broadcast %cst_22 : f32 to vector<8x1xf32>
      %c0_23 = arith.constant 0 : index
      %c0_24 = arith.constant 0 : index
      %30 = vector.load %arg9[%c0_23, %c0_24] : memref<8x1xf32, #tpu.memory_space<vmem>>, vector<8x1xf32>
      tpu.vector_store %arg9[%c0_23, %c0_24], %29 {strides = array<i32>} : memref<8x1xf32, #tpu.memory_space<vmem>>, vector<8x1xf32>,
    } else {
    }
    %c0_6 = arith.constant 0 : index
    %c0_7 = arith.constant 0 : index
    %9 = vector.load %arg8[%c0_6, %c0_7] : memref<8x1xf32, #tpu.memory_space<vmem>>, vector<8x1xf32>
    %cst_8 = arith.constant dense<0.000000e+00> : vector<8xf32>
    %10 = vector.multi_reduction <add>, %5, %cst_8 [1] : vector<8x128xf32> to vector<8xf32>
    %11 = vector.shape_cast %10 : vector<8xf32> to vector<8x1xf32>
    %12 = arith.addf %9, %11 : vector<8x1xf32>
    %c0_9 = arith.constant 0 : index
    %c0_10 = arith.constant 0 : index
    %13 = vector.load %arg8[%c0_9, %c0_10] : memref<8x1xf32, #tpu.memory_space<vmem>>, vector<8x1xf32>
    tpu.vector_store %arg8[%c0_9, %c0_10], %12 {strides = array<i32>} : memref<8x1xf32, #tpu.memory_space<vmem>>, vector<8x1xf32>,
    %c0_11 = arith.constant 0 : index
    %c0_12 = arith.constant 0 : index
    %14 = vector.load %arg9[%c0_11, %c0_12] : memref<8x1xf32, #tpu.memory_space<vmem>>, vector<8x1xf32>
    %15 = arith.mulf %5, %5 : vector<8x128xf32>
    %cst_13 = arith.constant dense<0.000000e+00> : vector<8xf32>
    %16 = vector.multi_reduction <add>, %15, %cst_13 [1] : vector<8x128xf32> to vector<8xf32>
    %17 = vector.shape_cast %16 : vector<8xf32> to vector<8x1xf32>
    %18 = arith.addf %14, %17 : vector<8x1xf32>
    %c0_14 = arith.constant 0 : index
    %c0_15 = arith.constant 0 : index
    %19 = vector.load %arg9[%c0_14, %c0_15] : memref<8x1xf32, #tpu.memory_space<vmem>>, vector<8x1xf32>
    tpu.vector_store %arg9[%c0_14, %c0_15], %18 {strides = array<i32>} : memref<8x1xf32, #tpu.memory_space<vmem>>, vector<8x1xf32>,
    %c128_i32 = arith.constant 128 : i32
    %20 = arith.muli %arg0, %c128_i32 : i32
    %21 = tpu.assume_multiple %20, 128 : i32
    %c0_16 = arith.constant 0 : index
    %22 = arith.index_cast %21 : i32 to index
    %23 = vector.load %arg7[%c0_16, %22] : memref<8x128xf32, #tpu.memory_space<vmem>>, vector<8x128xf32>
    tpu.vector_store %arg7[%c0_16, %22], %5 {strides = array<i32>} : memref<8x128xf32, #tpu.memory_space<vmem>>, vector<8x128xf32>,
    %c0_i32_17 = arith.constant 0 : i32
    %24 = arith.cmpi eq, %arg0, %c0_i32_17 : i32
    %25 = arith.extui %24 : i1 to i32
    %c0_i32_18 = arith.constant 0 : i32
    %26 = arith.cmpi ne, %25, %c0_i32_18 : i32
    scf.if %26 {
      %c0_19 = arith.constant 0 : index
      %27 = memref.load %arg1[%c0_19] : memref<1xi32, #tpu.memory_space<smem>>
      %28 = arith.sitofp %27 : i32 to f32
      %cst_20 = arith.constant 1.280000e+02 : f32
      %29 = arith.subf %cst_20, %28 : f32
      %c0_21 = arith.constant 0 : index
      %c0_22 = arith.constant 0 : index
      %30 = vector.load %arg8[%c0_21, %c0_22] : memref<8x1xf32, #tpu.memory_space<vmem>>, vector<8x1xf32>
      %c0_23 = arith.constant 0 : index
      %c0_24 = arith.constant 0 : index
      %31 = vector.load %arg9[%c0_23, %c0_24] : memref<8x1xf32, #tpu.memory_space<vmem>>, vector<8x1xf32>
      %c0_25 = arith.constant 0 : index
      %c0_26 = arith.constant 0 : index
      %32 = vector.load %arg4[%c0_25, %c0_26] : memref<8x1xf32, #tpu.memory_space<vmem>>, vector<8x1xf32>
      %c0_27 = arith.constant 0 : index
      %c0_28 = arith.constant 0 : index
      %33 = vector.load %arg5[%c0_27, %c0_28] : memref<8x1xf32, #tpu.memory_space<vmem>>, vector<8x1xf32>
      %c0_29 = arith.constant 0 : index
      %c0_30 = arith.constant 0 : index
      %34 = vector.load %arg6[%c0_29, %c0_30] : memref<8x1xf32, #tpu.memory_space<vmem>>, vector<8x1xf32>
      %35 = vector.broadcast %29 : f32 to vector<8x1xf32>
      %36 = arith.mulf %35, %32 : vector<8x1xf32>
      %37 = arith.subf %30, %36 : vector<8x1xf32>
      %38 = arith.mulf %32, %32 : vector<8x1xf32>
      %39 = vector.broadcast %29 : f32 to vector<8x1xf32>
      %40 = arith.mulf %39, %38 : vector<8x1xf32>
      %41 = arith.subf %31, %40 : vector<8x1xf32>
      %cst_31 = arith.constant 1.000000e+00 : f32
      %42 = arith.divf %cst_31, %28 : f32
      %43 = vector.broadcast %42 : f32 to vector<8x1xf32>
      %44 = arith.mulf %37, %43 : vector<8x1xf32>
      %45 = vector.broadcast %42 : f32 to vector<8x1xf32>
      %46 = arith.mulf %41, %45 : vector<8x1xf32>
      %47 = arith.mulf %44, %44 : vector<8x1xf32>
      %48 = arith.subf %46, %47 : vector<8x1xf32>
      %cst_32 = arith.constant 9.99999974E-6 : f32
      %49 = vector.broadcast %cst_32 : f32 to vector<8x1xf32>
      %50 = arith.addf %48, %49 : vector<8x1xf32>
      %51 = math.rsqrt %50 : vector<8x1xf32>
      %52 = arith.mulf %33, %51 : vector<8x1xf32>
      %53 = arith.mulf %44, %52 : vector<8x1xf32>
      %54 = arith.subf %34, %53 : vector<8x1xf32>
      %c0_33 = arith.constant 0 : index
      %c0_34 = arith.constant 0 : index
      %55 = vector.load %arg7[%c0_33, %c0_34] : memref<8x128xf32, #tpu.memory_space<vmem>>, vector<8x128xf32>
      %56 = vector.broadcast %52 : vector<8x1xf32> to vector<8x128xf32>
      %57 = arith.mulf %55, %56 : vector<8x128xf32>
      %58 = vector.broadcast %54 : vector<8x1xf32> to vector<8x128xf32>
      %59 = arith.addf %57, %58 : vector<8x128xf32>
      %cst_35 = arith.constant 0.000000e+00 : f32
      %60 = vector.broadcast %cst_35 : f32 to vector<8x128xf32>
      %61 = arith.maximumf %59, %60 : vector<8x128xf32>
      %c0_36 = arith.constant 0 : index
      %c0_37 = arith.constant 0 : index
      %62 = vector.load %arg7[%c0_36, %c0_37] : memref<8x128xf32, #tpu.memory_space<vmem>>, vector<8x128xf32>
      tpu.vector_store %arg7[%c0_36, %c0_37], %61 {strides = array<i32>} : memref<8x128xf32, #tpu.memory_space<vmem>>, vector<8x128xf32>,
    } else {
    }
    return
  }
  func.func @transform_0(%arg0: i32, %arg1: memref<1xi32, #tpu.memory_space<smem>>) -> (i32, i32) {
    %c0_i32 = arith.constant 0 : i32
    %c0_i32_0 = arith.constant 0 : i32
    return %c0_i32, %arg0 : i32, i32
  }
  func.func @transform_1(%arg0: i32, %arg1: memref<1xi32, #tpu.memory_space<smem>>) -> (i32, i32) {
    %c0_i32 = arith.constant 0 : i32
    %c0_i32_0 = arith.constant 0 : i32
    %c0_i32_1 = arith.constant 0 : i32
    return %c0_i32, %c0_i32_0 : i32, i32
  }
  func.func @transform_2(%arg0: i32, %arg1: memref<1xi32, #tpu.memory_space<smem>>) -> (i32, i32) {
    %c0_i32 = arith.constant 0 : i32
    %c0_i32_0 = arith.constant 0 : i32
    %c0_i32_1 = arith.constant 0 : i32
    return %c0_i32, %c0_i32_0 : i32, i32
  }
  func.func @transform_3(%arg0: i32, %arg1: memref<1xi32, #tpu.memory_space<smem>>) -> (i32, i32) {
    %c0_i32 = arith.constant 0 : i32
    %c0_i32_0 = arith.constant 0 : i32
    %c0_i32_1 = arith.constant 0 : i32
    return %c0_i32, %c0_i32_0 : i32, i32
  }
  func.func @transform_4(%arg0: i32, %arg1: memref<1xi32, #tpu.memory_space<smem>>) -> (i32, i32) {
    %c0_i32 = arith.constant 0 : i32
    %c0_i32_0 = arith.constant 0 : i32
    %c0_i32_1 = arith.constant 0 : i32
    return %c0_i32, %c0_i32_0 : i32, i32
  }
  func.func @transform_5(%arg0: i32, %arg1: memref<1xi32, #tpu.memory_space<smem>>) -> (i32, i32) {
    %c0_i32 = arith.constant 0 : i32
    %c0_i32_0 = arith.constant 0 : i32
    %c0_i32_1 = arith.constant 0 : i32
    return %c0_i32, %c0_i32_0 : i32, i32
  }
}

</mosaic_0001>

<bundles_post_ra>
// kernel: tpu_custom_call.1
= control target key start
LH: loop header
LB: loop body
LE: loop exit
PB: predicated region body
PF: predicated region fallthrough
CT: control target
= control target key end

     0   :  { %vm32_vm0 = vcmask 130048   ;;  %v203_v3 = vmov 0   ;;  %s277_s0 = inlined_call_operand.<no memory space> [shape: s32[1], index: 0, kind: input, shape index: {}]   ;;  %s278_s1 = inlined_call_operand.vmem [shape: f32[16,128], index: 1, kind: input, shape index: {}]   ;;  %s279_s2 = inlined_call_operand.vmem [shape: f32[8,16], index: 2, kind: input, shape index: {}]   ;;  %s280_s3 = inlined_call_operand.vmem [shape: f32[8,1], index: 3, kind: input, shape index: {}]   ;;  %s281_s4 = inlined_call_operand.vmem [shape: f32[8,1], index: 4, kind: input, shape index: {}]   ;;  %s282_s5 = inlined_call_operand.vmem [shape: f32[8,1], index: 5, kind: input, shape index: {}]   ;;  %s283_s6 = inlined_call_operand.hbm [shape: f32[8,128], index: 6, kind: output, shape index: {}]  }
   0x1   :  { %v25_v0 = vld [vmem:[%s278_s1 + $0x8] sm:$0xff]  ;;  %v24_v1 = vld [vmem:[%s278_s1] sm:$0xff]  ;;  %170 = vset.pattern.permute.xlu0 %v203_v3 }
   0x2   :  { %50 = vmatpush.msra.mxu0 %v25_v0  ;;  %v23_v2 = vld [vmem:[%s279_s2] sm:$0xff] }
   0x3   :  { %v26_v4 = vld [vmem:[%s280_s3] sm:$0xff] }
   0x4   :  { %12 = vsyncpa [#allocation7], 0  ;;  %29 = vperm.xlu0 %170, %v26_v4   ;;  %171 = vset.pattern.permute.xlu1 %v203_v3  ;;  %s84_s30 = scvt.s32.f32 %s277_s0  ;;  %vm60_vm1 = vcmask 7168   ;;  %v204_v6 = vmov 0.0   ;;  %v94_v28 = vmul.f32 %v26_v4, %v26_v4  ;;  %v89_v46 = vld [vmem:[%s281_s4] sm:$0xff]  ;;  %s205_s14 = smov [#allocation6]  }
   0x5   :  { %51 = vmatpush.msra.mxu0 %v24_v1  ;;  %172 = vset.pattern.permute.xlu2 %v203_v3  ;;  %61 = vst.msk [vmem:[#allocation2] sm:$0xff] %vm60_vm1, %v204_v6  ;;  %v90_v50 = vld [vmem:[%s282_s5] sm:$0xff]  ;;  %s152_s15 = sshll.u32 %s205_s14, 4  ;;  %s154_s17 = sshll.u32 %s283_s6, 4  ;;  %s153_s15 = int_to_ptr.vmem [resolvable:$true] %s152_s15  ;;  %s155_s17 = int_to_ptr.hbm [resolvable:$true] %s154_s17 }
   0x6   :  { %164 = vmatmul.msk.f32.vlgmr.msra.gmra.mxu0 %vm32_vm0, %v23_v2  ;;  %v97_v5 = vstv %s84_s30  ;;  %62 = vst.msk [vmem:[#allocation3] sm:$0xff] %vm60_vm1, %v204_v6  ;;  %s85_s9 = ssub.f32 128.0, %s84_s30 }
   0x7   :  { %173 = vrcp.f32 %v97_v5  ;;  %v109_v9 = vand.u32 2147483648, %v97_v5  ;;  %vm103_vm2 = vweird.f32 %v97_v5  ;;  %v107_v11 = vand.u32 2147483647, %v97_v5 }
   0x8   :  { %v91_v27 = vstv %s85_s9 }
   0x9   :  { %v110_v13 = vor.u32 1.1754944e-38, %v109_v9  ;;  %vm108_vm5 = vcmp.eq.f32.partialorder %v107_v11, 8.507059e+37  ;;  %v92_v29 = vmul.f32 %v91_v27, %v26_v4  ;;  %v95_v30 = vmul.f32 %v94_v28, %v91_v27 }
   0xc   :  { %v63_v21 = vld [vmem:[#allocation2] sm:$0xff] }
   0xd   :  { %v174_v7 = vpop.eup %173  ;;  %v69_v23 = vld [vmem:[#allocation3] sm:$0xff] }
   0xe   :  { %v99_v8 = vmul.f32 %v174_v7, %v97_v5  ;;  %vm104_vm3 = vweird.f32 %v174_v7 }
   0xf   :  { %vm105_vm4 = vmor %vm103_vm2, %vm104_vm3 }
  0x10   :  { %v100_v10 = vsub.f32 1.0, %v99_v8 }
  0x12   :  { %v101_v12 = vmul.f32 %v174_v7, %v100_v10 }
  0x14   :  { %v102_v14 = vadd.f32 %v174_v7, %v101_v12 }
  0x16   :  { %v106_v15 = vsel %vm105_vm4, %v174_v7, %v102_v14 }
  0x17   :  { %v111_v16 = vsel %vm108_vm5, %v110_v13, %v106_v15 }
  0x18   :  { %165 = vpush %v111_v16 }
  0x49   :  { %s166_s10 = spop %165 }
  0x4a   :  { %v113_v32 = vstv %s166_s10 }
  0x76   :  { %v30_v17 = vpop.permute.xlu0 %29 }
  0x83   :  { %v53_v18 = vpop.f32.mrf.mxu0 }
  0x84   :  { %v54_v19 = vadd.f32 %v53_v18, %v30_v17 }
  0x86   :  { %64 = vadd.xlane.f32.xlu0 %v54_v19  ;;  %v70_v20 = vmul.f32 %v54_v19, %v54_v19 }
  0x88   :  { %71 = vadd.xlane.f32.xlu1 %v70_v20 }
  0xf9   :  { %v65_v22 = vpop.xlane.xlu0 %64 }
  0xfa   :  { %v66_v24 = vadd.f32 %v65_v22, %v63_v21 }
  0xfb   :  { %v72_v25 = vpop.xlane.xlu1 %71 }
  0xfc   :  { %68 = vst.msk [vmem:[#allocation2] sm:$0xff] %vm60_vm1, %v66_v24  ;;  %v73_v26 = vadd.f32 %v72_v25, %v69_v23 }
  0xfe   :  { %74 = vst.msk [vmem:[#allocation3] sm:$0xff] %vm60_vm1, %v73_v26 }
 0x103   :  { %v86_v31 = vld [vmem:[#allocation2] sm:$0xff] }
 0x104   :  { %v93_v33 = vsub.f32 %v86_v31, %v92_v29 }
 0x105   :  { %v87_v34 = vld [vmem:[#allocation3] sm:$0xff] }
 0x106   :  { %v96_v35 = vsub.f32 %v87_v34, %v95_v30  ;;  %v114_v36 = vmul.f32 %v113_v32, %v93_v33 }
 0x108   :  { %v115_v37 = vmul.f32 %v113_v32, %v96_v35  ;;  %v116_v38 = vmul.f32 %v114_v36, %v114_v36 }
 0x10a   :  { %v117_v39 = vsub.f32 %v115_v37, %v116_v38 }
 0x10c   :  { %v118_v40 = vadd.f32 1e-05, %v117_v39 }
 0x10e   :  { %175 = vrsqrt.f32 %v118_v40  ;;  %vm125_vm7 = vweird.f32 %v118_v40 }
 0x114   :  { %v176_v41 = vpop.eup %175 }
 0x115   :  { %v120_v42 = vmul.f32 %v176_v41, %v118_v40  ;;  %vm126_vm6 = vweird.f32 %v176_v41 }
 0x116   :  { %vm127_vm8 = vmor %vm125_vm7, %vm126_vm6 }
 0x117   :  { %v121_v43 = vmul.f32 %v176_v41, %v120_v42 }
 0x119   :  { %v122_v44 = vmul.f32 0.5, %v121_v43 }
 0x11b   :  { %v123_v45 = vsub.f32 1.5, %v122_v44 }
 0x11d   :  { %v124_v47 = vmul.f32 %v176_v41, %v123_v45 }
 0x11f   :  { %v128_v48 = vsel %vm127_vm8, %v176_v41, %v124_v47 }
 0x120   :  { %v129_v49 = vmul.f32 %v128_v48, %v89_v46 }
 0x122   :  { %v130_v51 = vmul.f32 %v129_v49, %v114_v36  ;;  %135 = vperm.xlu1 %171, %v129_v49  }
 0x124   :  { %v131_v52 = vsub.f32 %v90_v50, %v130_v51 }
 0x126   :  { %141 = vperm.xlu2 %172, %v131_v52  }
 0x180   :  { %v142_v55 = vpop.permute.xlu2 %141 }
 0x194   :  { %v136_v53 = vpop.permute.xlu1 %135 }
 0x195   :  { %v138_v54 = vmul.f32 %v136_v53, %v54_v19 }
 0x197   :  { %v144_v56 = vadd.f32 %v142_v55, %v138_v54 }
 0x199   :  { %v145_v57 = vmax.f32 %v144_v56, 0.0 }
 0x19b   :  { %146 = vst [vmem:[#allocation6] sm:$0xff] %v145_v57 }
 0x19c   :  { %157 = dma.vmem_to_hbm [thread:$0]  %s153_s15, 128, %s155_s17, [#allocation7]  }
 0x19d   :  { %201 = dma.done.wait [#allocation7], 128  }
 0x19e   :  { %202 = vsyncadd [#allocation7], 4294967168 }
 0x19f   :  { %162 = vsyncpa [#allocation7], 1 }

</bundles_post_ra>
